<compile_context>
chip_gen: v5e
topology: v5e:2x2
jax: 0.10.0
libtpu: 0.0.40
codegen_flags: <defaults>
</compile_context>

<pallas_src>
import math

import jax
import jax.numpy as jnp
from jax.experimental import pallas as pl
from jax.experimental.pallas import tpu as pltpu


def build_pe_table(d_model: int, max_len: int, dtype=jnp.float32) -> jnp.ndarray:
    """Sinusoidal positional-encoding table, shape [max_len, d_model].

    Build this once at module init, already in the model dtype, so no per-call
    cast / rewrite of the table is needed.
    """
    assert d_model % 2 == 0, "d_model must be even (as in the reference init)"
    position = jnp.arange(max_len, dtype=jnp.float32)[:, None]              # [L, 1]
    div_term = jnp.exp(
        jnp.arange(0, d_model, 2, dtype=jnp.float32) * (-math.log(10000.0) / d_model)
    )                                                                        # [D/2]
    angles = position * div_term                                             # [L, D/2]
    # interleave: pe[:, 0::2] = sin, pe[:, 1::2] = cos
    pe = jnp.stack([jnp.sin(angles), jnp.cos(angles)], axis=-1)              # [L, D/2, 2]
    return pe.reshape(max_len, d_model).astype(dtype)                        # [L, D]


def _pos_enc_kernel(x_ref, pe_ref, o_ref):
    # x_ref / o_ref: (ts, B*D) lane-dense tiles.
    # pe_ref: (ts, D) (broadcast over batch here) or (ts, B*D) (fallback path).
    d = pe_ref.shape[-1]
    n_rep = x_ref.shape[-1] // d
    for b in range(n_rep):  # static unroll; each slice is a lane-aligned (ts, d) block
        sl = pl.ds(b * d, d)
        # Re-read pe from VMEM per slice (cheap vld) instead of hoisting the
        # whole tile into one long-lived value -> no vreg-spill pressure.
        o_ref[:, sl] = x_ref[:, sl] + pe_ref[...]


def _sublane_multiple(itemsize: int) -> int:
    """Packed-sublane multiple for the dtype: 8 (4B), 16 (2B), 32 (1B)."""
    return {1: 32, 2: 16}.get(itemsize, 8)


def _pick_seq_tile(
    seq_len: int,
    row_bytes: int,
    itemsize: int,
    target_bytes: int = 4 << 20,   # ~4 MiB tiles: near HBM roofline on v5e/v6e/v7x
    floor_bytes: int = 1 << 20,    # never shrink tiles below ~1 MiB for more steps
    min_steps: int = 4,            # prefer >=4 steps so read/write DMAs overlap
) -> int:
    """Rows per sequence tile for an HBM-bound elementwise add."""
    sub = _sublane_multiple(itemsize)
    # Largest tile near target_bytes, rounded down to the packed-sublane multiple.
    ts = max(sub, (target_bytes // max(row_bytes, 1)) // sub * sub)
    if ts >= seq_len:
        ts = seq_len  # whole sequence in one block (block == full dim is legal)
    steps = pl.cdiv(seq_len, ts)
    if steps < min_steps:
        # Try to get min_steps pipeline stages, but only if each tile stays
        # above the ~1 MiB HBM-efficiency floor (tiny tiles cost 2-3x BW).
        cand = -(-pl.cdiv(seq_len, min_steps) // sub) * sub
        if cand * row_bytes >= floor_bytes and cand < ts:
            ts = cand
    return max(ts, 1)


def positional_encoding(x: jnp.ndarray, pe: jnp.ndarray, *, donate_x: bool = False) -> jnp.ndarray:
    """x: [S, B, D]; pe: [max_len, D]. Returns x + pe[:S, None, :] (eval-mode forward)."""
    S, B, D = x.shape
    max_len, Dp = pe.shape
    assert S <= max_len, f"sequence length {S} exceeds max_len {max_len}"
    assert Dp == D

    if pe.dtype != x.dtype:
        # Safety net only; build the table in the model dtype at init instead.
        pe = pe.astype(x.dtype)

    itemsize = jnp.dtype(x.dtype).itemsize
    row_bytes = B * D * itemsize
    sub = _sublane_multiple(itemsize)
    ts = _pick_seq_tile(S, row_bytes, itemsize)

    if D % 128 == 0:
        pe_k = pe                       # [max_len, D]; broadcast over batch in-kernel
    else:
        # Fallback: tile only the S rows actually used (never the full max_len
        # table) so pe traffic stays O(S*B*D); add becomes a dense 2-D op.
        pe_k = jnp.tile(pe[:S], (1, B))  # [S, B*D]

    # Mixed-extent clipping: if the last block is partial, or a single
    # full-sequence block is not sublane-aligned, clip pe to exactly S rows so
    # both inputs share the same row extent (and full-array block shapes stay legal).
    if pe_k.shape[0] != S and ((S % ts != 0) or (ts == S and S % sub != 0)):
        pe_k = pe_k[:S]

    pe_w = pe_k.shape[1]
    x2 = x.reshape(S, B * D)            # free view: row-major merge of (batch, d_model)

    # Size scoped VMEM to the actual double-buffered footprint so large tiles
    # also work under v5e's 16 MiB scoped default (and stay < v7x's 64 MiB).
    x_tile_bytes = ts * B * D * itemsize
    pe_tile_bytes = ts * pe_w * itemsize
    vmem_need = 4 * x_tile_bytes + 2 * pe_tile_bytes + (4 << 20)
    vmem_limit = int(min(max(vmem_need, 16 << 20), 64 << 20))

    cost = pl.CostEstimate(
        flops=S * B * D,
        transcendentals=0,
        bytes_accessed=2 * S * B * D * itemsize + S * pe_w * itemsize,
    )

    extra = {"input_output_aliases": {0: 0}} if donate_x else {}

    out = pl.pallas_call(
        _pos_enc_kernel,
        out_shape=jax.ShapeDtypeStruct((S, B * D), x.dtype),
        grid_spec=pltpu.PrefetchScalarGridSpec(
            num_scalar_prefetch=0,
            grid=(pl.cdiv(S, ts),),
            in_specs=[
                pl.BlockSpec((ts, B * D), lambda i: (i, 0)),
                # pe table windowed via index_map (no per-call slice copy when
                # ts | S and the block is sublane-aligned).
                pl.BlockSpec((ts, pe_w), lambda i: (i, 0)),
            ],
            out_specs=pl.BlockSpec((ts, B * D), lambda i: (i, 0)),
        ),
        compiler_params=pltpu.CompilerParams(
            dimension_semantics=("parallel",),
            vmem_limit_bytes=vmem_limit,
        ),
        cost_estimate=cost,
        **extra,
    )(x2, pe_k)

    return out.reshape(S, B, D)


if __name__ == "__main__":
    key = jax.random.PRNGKey(0)

    # Primary case: lane-dense d_model (multiple of 128), broadcast-over-batch path.
    seq_len, batch, d_model, max_len = 16, 2, 128, 64
    x = jax.random.normal(key, (seq_len, batch, d_model), dtype=jnp.float32)
    pe = build_pe_table(d_model, max_len, dtype=x.dtype)  # built once in model dtype
    out = jax.block_until_ready(positional_encoding(x, pe))
    ref = x + pe[:seq_len][:, None, :]
    assert out.shape == (seq_len, batch, d_model)
    assert jnp.allclose(out, ref, atol=1e-6), "mismatch vs reference (primary)"

    # Small extra checks for the review's correctness-concern paths.
    k1, k2 = jax.random.split(key)

    # (a) d_model not a multiple of 128 -> pe[:S]-tiled fallback path.
    xb = jax.random.normal(k1, (24, 2, 64), dtype=jnp.float32)
    peb = build_pe_table(64, 32, dtype=xb.dtype)
    outb = jax.block_until_ready(positional_encoding(xb, peb))
    assert jnp.allclose(outb, xb + peb[:24][:, None, :], atol=1e-6), "mismatch (fallback)"

    # (b) non-sublane-aligned sequence length on the broadcast path (ragged clip).
    xc = jax.random.normal(k2, (20, 1, 128), dtype=jnp.float32)
    pec = build_pe_table(128, 64, dtype=xc.dtype)
    outc = jax.block_until_ready(positional_encoding(xc, pec))
    assert jnp.allclose(outc, xc + pec[:20][:, None, :], atol=1e-6), "mismatch (ragged)"

    print("KERNEL_OK")
</pallas_src>

<mosaic_0001>
module attributes {stable_mosaic.version = 11 : i64} {
  func.func @_pos_enc_kernel(%arg0: i32, %arg1: memref<16x256xf32, #tpu.memory_space<vmem>>, %arg2: memref<16x128xf32, #tpu.memory_space<vmem>>, %arg3: memref<16x256xf32, #tpu.memory_space<vmem>>) attributes {dimension_semantics = [#tpu.dimension_semantics<parallel>], iteration_bounds = array<i64: 1>, scalar_prefetch = 0 : i64, scratch_operands = 0 : i64, tpu.core_type = #tpu.core_type<tc>, window_params = [{transform_indices = @transform_0, window_bounds = array<i64: 16, 256>}, {transform_indices = @transform_1, window_bounds = array<i64: 16, 128>}, {transform_indices = @transform_2, window_bounds = array<i64: 16, 256>}]} {
    %c0 = arith.constant 0 : index
    %c0_0 = arith.constant 0 : index
    %0 = vector.load %arg1[%c0, %c0_0] : memref<16x256xf32, #tpu.memory_space<vmem>>, vector<16x128xf32>
    %c0_1 = arith.constant 0 : index
    %c0_2 = arith.constant 0 : index
    %1 = vector.load %arg2[%c0_1, %c0_2] : memref<16x128xf32, #tpu.memory_space<vmem>>, vector<16x128xf32>
    %2 = arith.addf %0, %1 : vector<16x128xf32>
    %c0_3 = arith.constant 0 : index
    %c0_4 = arith.constant 0 : index
    %3 = vector.load %arg3[%c0_3, %c0_4] : memref<16x256xf32, #tpu.memory_space<vmem>>, vector<16x128xf32>
    tpu.vector_store %arg3[%c0_3, %c0_4], %2 {strides = array<i32>} : memref<16x256xf32, #tpu.memory_space<vmem>>, vector<16x128xf32>,
    %c0_5 = arith.constant 0 : index
    %c128 = arith.constant 128 : index
    %4 = vector.load %arg1[%c0_5, %c128] : memref<16x256xf32, #tpu.memory_space<vmem>>, vector<16x128xf32>
    %c0_6 = arith.constant 0 : index
    %c0_7 = arith.constant 0 : index
    %5 = vector.load %arg2[%c0_6, %c0_7] : memref<16x128xf32, #tpu.memory_space<vmem>>, vector<16x128xf32>
    %6 = arith.addf %4, %5 : vector<16x128xf32>
    %c0_8 = arith.constant 0 : index
    %c128_9 = arith.constant 128 : index
    %7 = vector.load %arg3[%c0_8, %c128_9] : memref<16x256xf32, #tpu.memory_space<vmem>>, vector<16x128xf32>
    tpu.vector_store %arg3[%c0_8, %c128_9], %6 {strides = array<i32>} : memref<16x256xf32, #tpu.memory_space<vmem>>, vector<16x128xf32>,
    return
  }
  func.func @transform_0(%arg0: i32) -> (i32, i32) {
    %c0_i32 = arith.constant 0 : i32
    %c0_i32_0 = arith.constant 0 : i32
    return %arg0, %c0_i32 : i32, i32
  }
  func.func @transform_1(%arg0: i32) -> (i32, i32) {
    %c0_i32 = arith.constant 0 : i32
    %c0_i32_0 = arith.constant 0 : i32
    return %arg0, %c0_i32 : i32, i32
  }
  func.func @transform_2(%arg0: i32) -> (i32, i32) {
    %c0_i32 = arith.constant 0 : i32
    %c0_i32_0 = arith.constant 0 : i32
    return %arg0, %c0_i32 : i32, i32
  }
}

</mosaic_0001>

<bundles_post_ra>
// kernel: tpu_custom_call.1
= control target key start
LH: loop header
LB: loop body
LE: loop exit
PB: predicated region body
PF: predicated region fallthrough
CT: control target
= control target key end

     0   :  { %7 = vsyncpa [#allocation3], 0  ;;  %s202_s0 = inlined_call_operand.hbm [shape: f32[16,256], index: 0, kind: input, shape index: {}]   ;;  %s203_s1 = inlined_call_operand.hbm [shape: f32[64,128], index: 1, kind: input, shape index: {}]   ;;  %s204_s2 = inlined_call_operand.hbm [shape: f32[16,256], index: 2, kind: output, shape index: {}]  }
   0x1   :  { %8 = vsyncpa [#allocation6], 0 }
   0x2   :  { %9 = vsyncpa [#allocation4], 0  ;;  %s14_s11 = sshll.u32 %s202_s0, 4  ;;  %s165_s12 = smov [#allocation2]   ;;  %s15_s11 = int_to_ptr.hbm [resolvable:$true] %s14_s11 }
   0x3   :  { %s16_s13 = sshll.u32 %s165_s12, 4  ;;  %s27_s16 = sshll.u32 %s203_s1, 4  ;;  %s17_s13 = int_to_ptr.vmem [resolvable:$true] %s16_s13  ;;  %s28_s16 = int_to_ptr.hbm [resolvable:$true] %s27_s16 }
   0x4   :  { %s166_s17 = smov 256   ;;  %s167_s18 = smov 16  }
   0x5   :  { %22 = dma.hbm_to_vmem [thread:$0]  %s15_s11, 512, %s17_s13, [#allocation3], %s166_s17, %s166_s17, %s167_s18  }
   0x6   :  { %s168_s19 = smov [#allocation5]   ;;  %s169_s21 = smov 128  }
   0x7   :  { %s29_s20 = sshll.u32 %s168_s19, 4  ;;  %s170_s0 = smov 8   ;;  %s30_s20 = int_to_ptr.vmem [resolvable:$true] %s29_s20 }
   0x8   :  { %35 = dma.hbm_to_vmem [thread:$0]  %s28_s16, 256, %s30_s20, [#allocation6], %s169_s21, %s169_s21, %s170_s0  }
   0x9   :  { %159 = dma.done.wait [#allocation3], 512  }
   0xa   :  { %160 = vsyncadd [#allocation3], 4294966784 }
   0xb   :  { %161 = dma.done.wait [#allocation6], 256  }
   0xc   :  { %162 = vsyncadd [#allocation6], 4294967040  ;;  %v44_v0 = vld [vmem:[#allocation2] sm:$0xff]  ;;  %v45_v2 = vld [vmem:[#allocation2 + $0x10] sm:$0xff]  ;;  %s171_s1 = smov [#allocation7]   ;;  %s66_s25 = sshll.u32 %s204_s2, 4  ;;  %s67_s25 = int_to_ptr.hbm [resolvable:$true] %s66_s25 }
   0xd   :  { %v46_v1 = vld [vmem:[#allocation5] sm:$0xff]  ;;  %v47_v4 = vld [vmem:[#allocation5 + $0x8] sm:$0xff]  ;;  %v53_v6 = vld [vmem:[#allocation2 + $0x18] sm:$0xff]  ;;  %s64_s22 = sshll.u32 %s171_s1, 4  ;;  %s65_s22 = int_to_ptr.vmem [resolvable:$true] %s64_s22 }
   0xe   :  { %v48_v3 = vadd.f32 %v46_v1, %v44_v0  ;;  %v52_v5 = vld [vmem:[#allocation2 + $0x8] sm:$0xff]  ;;  %v49_v7 = vadd.f32 %v47_v4, %v45_v2  ;;  %v57_v9 = vadd.f32 %v53_v6, %v47_v4 }
   0xf   :  { %v56_v8 = vadd.f32 %v52_v5, %v46_v1 }
  0x10   :  { %50 = vst [vmem:[#allocation7] sm:$0xff] %v48_v3 }
  0x11   :  { %51 = vst [vmem:[#allocation7 + $0x10] sm:$0xff] %v49_v7 }
  0x12   :  { %58 = vst [vmem:[#allocation7 + $0x8] sm:$0xff] %v56_v8 }
  0x13   :  { %59 = vst [vmem:[#allocation7 + $0x18] sm:$0xff] %v57_v9 }
  0x14   :  { %72 = dma.vmem_to_hbm [thread:$0]  %s65_s22, 512, %s67_s25, [#allocation4], %s166_s17, %s166_s17, %s167_s18  }
  0x15   :  { %163 = dma.done.wait [#allocation4], 512  }
  0x16   :  { %164 = vsyncadd [#allocation4], 4294966784 }
  0x17   :  { %77 = vsyncpa [#allocation3], 1 }
  0x18   :  { %78 = vsyncpa [#allocation6], 1 }
  0x19   :  { %79 = vsyncpa [#allocation4], 1 }

</bundles_post_ra>
